<compile_context>
chip_gen: v7x
topology: tpu7x:2x2x1
jax: 0.10.0
libtpu: 0.0.40
codegen_flags: <defaults>
</compile_context>

<pallas_src>
import functools

import jax
import jax.numpy as jnp
from jax.experimental import pallas as pl
from jax.experimental.pallas import tpu as pltpu


def _round_up(v, m):
    return ((v + m - 1) // m) * m


def _gem_kernel(p_ref, mode_ref, x_ref, o_ref, acc_ref, *,
                eps, inv_cols, cols, tc, mask_cols):
    # p_ref:    (1,) f32 scalar-prefetch (SMEM) — GeM exponent.
    # mode_ref: (1,) i32 scalar-prefetch (SMEM) — 3 / 2 for the VPU fast paths, 0 general.
    # x_ref:    (tr, tc) input tile (VMEM).
    # o_ref:    (tr, 1) pooled output tile (VMEM), written on the last col step.
    # acc_ref:  (tr, 1) f32 partial-sum scratch, persists across the col axis.
    j = pl.program_id(1)
    nj = pl.num_programs(1)

    @pl.when(j == 0)
    def _():
        acc_ref[...] = jnp.zeros_like(acc_ref)

    x = jnp.maximum(x_ref[...].astype(jnp.float32), eps)   # clamp(min=eps) -> x > 0

    if mask_cols:
        # Last col tile may be partial; zero the contribution of stale lanes.
        lane = jax.lax.broadcasted_iota(jnp.int32, x.shape, dimension=1)
        valid = lane < (cols - j * tc)
    else:
        valid = None

    def accumulate(xp):
        if valid is not None:
            xp = jnp.where(valid, xp, 0.0)
        acc_ref[...] += jnp.sum(xp, axis=-1, keepdims=True)

    p = p_ref[0]
    mode = mode_ref[0]

    @pl.when(mode == 3)      # default p == 3: pure VPU multiplies, no EUP work.
    def _():
        accumulate(x * x * x)

    @pl.when(mode == 2)      # p == 2: single VPU multiply.
    def _():
        accumulate(x * x)

    @pl.when(mode == 0)      # learned / non-integer exponent: x >= eps > 0 so exp/log is exact.
    def _():
        accumulate(jnp.exp(p * jnp.log(x)))

    @pl.when(j == nj - 1)
    def _():
        pooled = acc_ref[...] * inv_cols            # (tr, 1), strictly positive
        o_ref[...] = jnp.exp(jnp.log(pooled) / p).astype(o_ref.dtype)


def gem_pool(x, p, *, eps=1e-6):
    """GeM pooling. x: (N, C, H, W); p: scalar array shape (1,). Returns (N, C, 1, 1)."""
    n, c, h, w = x.shape
    rows = n * c
    cols = h * w
    x2d = x.reshape(rows, cols)

    itemsize = jnp.dtype(x.dtype).itemsize
    # Packed sublane multiple: 8 for 32-bit, 16 for bf16/f16, 32 for 8-bit.
    sub = {4: 8, 2: 16, 1: 32}.get(itemsize, 8)

    # ---- generation-aware VMEM budget ------------------------------------------------
    try:
        vmem_cap = pltpu.get_tpu_info().vmem_capacity_bytes
    except Exception:
        vmem_cap = None
    if vmem_cap is not None and vmem_cap > (96 << 20):
        # v5e / v6e: 128 MiB physical VMEM, 1 TensorCore per chip.
        buf_cap = 16 << 20
        vmem_limit = 64 << 20
        two_tc_hint = False
    else:
        # v7x (64 MiB per TC, 2 TCs) or unknown: stay conservative.
        buf_cap = 10 << 20
        vmem_limit = 40 << 20
        two_tc_hint = True

    # ---- column (H*W) tiling ----------------------------------------------------------
    # VMEM footprint uses the lane-padded width.
    if _round_up(cols, 128) * itemsize * sub <= buf_cap:
        tc = cols                       # full-extent block on the lane axis
        mask_cols = False
    else:
        tc = max(128, (buf_cap // (sub * itemsize)) // 128 * 128)
        mask_cols = (cols % tc) != 0

    # ---- row (N*C) tiling ---------------------------------------------------------------
    tr_cap = max(sub, (buf_cap // (_round_up(tc, 128) * itemsize)) // sub * sub)
    if tr_cap >= rows:
        tr = rows
        # On 2-TC chips make sure the "parallel" axis has >= 2 tiles so both cores work.
        if two_tc_hint and rows > sub:
            tr = min(rows, max(sub, _round_up(pl.cdiv(rows, 2), sub)))
    else:
        tr = max(sub, (tr_cap // sub) * sub)

    grid = (pl.cdiv(rows, tr), pl.cdiv(cols, tc))

    p1 = jnp.asarray(p, dtype=jnp.float32).reshape(1)
    # Runtime selection of the VPU fast paths (exact-integer exponent).
    mode = jnp.where(p1 == jnp.float32(3.0), 3,
                     jnp.where(p1 == jnp.float32(2.0), 2, 0)).astype(jnp.int32)

    out = pl.pallas_call(
        functools.partial(
            _gem_kernel,
            eps=eps,
            inv_cols=1.0 / cols,
            cols=cols,
            tc=tc,
            mask_cols=mask_cols,
        ),
        out_shape=jax.ShapeDtypeStruct((rows, 1), x.dtype),
        grid_spec=pltpu.PrefetchScalarGridSpec(
            num_scalar_prefetch=2,
            grid=grid,
            in_specs=[
                pl.BlockSpec((tr, tc), lambda i, j, p_s, m_s: (i, j)),
            ],
            out_specs=pl.BlockSpec((tr, 1), lambda i, j, p_s, m_s: (i, 0)),
            scratch_shapes=[pltpu.VMEM((tr, 1), jnp.float32)],
        ),
        compiler_params=pltpu.CompilerParams(
            dimension_semantics=("parallel", "arbitrary"),
            vmem_limit_bytes=vmem_limit,
        ),
    )(p1, mode, x2d)

    return out.reshape(n, c, 1, 1)


def gem_pool_ref(x, p, *, eps=1e-6):
    # Pure-JAX reference mirroring the PyTorch forward.
    pv = jnp.asarray(p, dtype=jnp.float32).reshape(())
    xc = jnp.maximum(x.astype(jnp.float32), eps)
    pooled = jnp.mean(jnp.power(xc, pv), axis=(-2, -1), keepdims=True)
    return jnp.power(pooled, 1.0 / pv).astype(x.dtype)


if __name__ == "__main__":
    key = jax.random.PRNGKey(0)
    N, C, H, W = 2, 4, 16, 16
    x = jax.random.uniform(key, (N, C, H, W), dtype=jnp.float32)

    # Default p = 3.0 (nn.Parameter(torch.ones(1) * 3.0)) -> cube fast path.
    p_default = jnp.ones((1,), dtype=jnp.float32) * 3.0
    out = gem_pool(x, p_default, eps=1e-6)
    jax.block_until_ready(out)
    ref = gem_pool_ref(x, p_default, eps=1e-6)
    assert out.shape == (N, C, 1, 1), out.shape
    assert jnp.allclose(out, ref, rtol=1e-4, atol=1e-5), (
        float(jnp.max(jnp.abs(out - ref))))

    # Learned / non-integer exponent -> general exp(p*log(x)) path.
    p_learned = jnp.ones((1,), dtype=jnp.float32) * 2.5
    out2 = gem_pool(x, p_learned, eps=1e-6)
    jax.block_until_ready(out2)
    ref2 = gem_pool_ref(x, p_learned, eps=1e-6)
    assert jnp.allclose(out2, ref2, rtol=1e-4, atol=1e-5), (
        float(jnp.max(jnp.abs(out2 - ref2))))

    # p = 2.0 -> square fast path.
    p_sq = jnp.ones((1,), dtype=jnp.float32) * 2.0
    out3 = gem_pool(x, p_sq, eps=1e-6)
    jax.block_until_ready(out3)
    ref3 = gem_pool_ref(x, p_sq, eps=1e-6)
    assert jnp.allclose(out3, ref3, rtol=1e-4, atol=1e-5), (
        float(jnp.max(jnp.abs(out3 - ref3))))

    # Odd shapes (classic GeM 7x7 spatial, rows not a multiple of 8): exercises
    # non-128 lane width and partial row tiles / masked writeback.
    x_odd = jax.random.uniform(jax.random.PRNGKey(1), (3, 5, 7, 7), dtype=jnp.float32)
    out4 = gem_pool(x_odd, p_default, eps=1e-6)
    jax.block_until_ready(out4)
    ref4 = gem_pool_ref(x_odd, p_default, eps=1e-6)
    assert out4.shape == (3, 5, 1, 1), out4.shape
    assert jnp.allclose(out4, ref4, rtol=1e-4, atol=1e-5), (
        float(jnp.max(jnp.abs(out4 - ref4))))

    print("KERNEL_OK")
</pallas_src>

<mosaic_0001>
module attributes {stable_mosaic.version = 11 : i64} {
  func.func @_gem_kernel(%arg0: i32, %arg1: i32, %arg2: memref<1xf32, #tpu.memory_space<smem>>, %arg3: memref<1xi32, #tpu.memory_space<smem>>, %arg4: memref<8x256xf32, #tpu.memory_space<vmem>>, %arg5: memref<8x1xf32, #tpu.memory_space<vmem>>, %arg6: memref<8x1xf32, #tpu.memory_space<vmem>>) attributes {dimension_semantics = [#tpu.dimension_semantics<parallel>, #tpu.dimension_semantics<arbitrary>], iteration_bounds = array<i64: 1, 1>, scalar_prefetch = 2 : i64, scratch_operands = 1 : i64, tpu.core_type = #tpu.core_type<tc>, window_params = [{transform_indices = @transform_0, window_bounds = array<i64: 8, 256>}, {transform_indices = @transform_1, window_bounds = array<i64: 8, 1>}]} {
    %c0_i32 = arith.constant 0 : i32
    %0 = arith.cmpi eq, %arg1, %c0_i32 : i32
    %1 = arith.extui %0 : i1 to i32
    %c0_i32_0 = arith.constant 0 : i32
    %2 = arith.cmpi ne, %1, %c0_i32_0 : i32
    scf.if %2 {
      %cst_10 = arith.constant 0.000000e+00 : f32
      %20 = vector.broadcast %cst_10 : f32 to vector<8x1xf32>
      %c0_11 = arith.constant 0 : index
      %c0_12 = arith.constant 0 : index
      %21 = vector.load %arg6[%c0_11, %c0_12] : memref<8x1xf32, #tpu.memory_space<vmem>>, vector<8x1xf32>
      tpu.vector_store %arg6[%c0_11, %c0_12], %20 {strides = array<i32>} : memref<8x1xf32, #tpu.memory_space<vmem>>, vector<8x1xf32>,
    } else {
    }
    %c0 = arith.constant 0 : index
    %c0_1 = arith.constant 0 : index
    %3 = vector.load %arg4[%c0, %c0_1] : memref<8x256xf32, #tpu.memory_space<vmem>>, vector<8x256xf32>
    %cst = arith.constant 9.99999997E-7 : f32
    %4 = vector.broadcast %cst : f32 to vector<8x256xf32>
    %5 = arith.maximumf %3, %4 : vector<8x256xf32>
    %c0_2 = arith.constant 0 : index
    %6 = memref.load %arg2[%c0_2] : memref<1xf32, #tpu.memory_space<smem>>
    %c0_3 = arith.constant 0 : index
    %7 = memref.load %arg3[%c0_3] : memref<1xi32, #tpu.memory_space<smem>>
    %c3_i32 = arith.constant 3 : i32
    %8 = arith.cmpi eq, %7, %c3_i32 : i32
    %9 = arith.extui %8 : i1 to i32
    %c0_i32_4 = arith.constant 0 : i32
    %10 = arith.cmpi ne, %9, %c0_i32_4 : i32
    scf.if %10 {
      %20 = arith.mulf %5, %5 : vector<8x256xf32>
      %21 = arith.mulf %20, %5 : vector<8x256xf32>
      %c0_10 = arith.constant 0 : index
      %c0_11 = arith.constant 0 : index
      %22 = vector.load %arg6[%c0_10, %c0_11] : memref<8x1xf32, #tpu.memory_space<vmem>>, vector<8x1xf32>
      %cst_12 = arith.constant dense<0.000000e+00> : vector<8xf32>
      %23 = vector.multi_reduction <add>, %21, %cst_12 [1] : vector<8x256xf32> to vector<8xf32>
      %24 = vector.shape_cast %23 : vector<8xf32> to vector<8x1xf32>
      %25 = arith.addf %22, %24 : vector<8x1xf32>
      %c0_13 = arith.constant 0 : index
      %c0_14 = arith.constant 0 : index
      %26 = vector.load %arg6[%c0_13, %c0_14] : memref<8x1xf32, #tpu.memory_space<vmem>>, vector<8x1xf32>
      tpu.vector_store %arg6[%c0_13, %c0_14], %25 {strides = array<i32>} : memref<8x1xf32, #tpu.memory_space<vmem>>, vector<8x1xf32>,
    } else {
    }
    %c2_i32 = arith.constant 2 : i32
    %11 = arith.cmpi eq, %7, %c2_i32 : i32
    %12 = arith.extui %11 : i1 to i32
    %c0_i32_5 = arith.constant 0 : i32
    %13 = arith.cmpi ne, %12, %c0_i32_5 : i32
    scf.if %13 {
      %20 = arith.mulf %5, %5 : vector<8x256xf32>
      %c0_10 = arith.constant 0 : index
      %c0_11 = arith.constant 0 : index
      %21 = vector.load %arg6[%c0_10, %c0_11] : memref<8x1xf32, #tpu.memory_space<vmem>>, vector<8x1xf32>
      %cst_12 = arith.constant dense<0.000000e+00> : vector<8xf32>
      %22 = vector.multi_reduction <add>, %20, %cst_12 [1] : vector<8x256xf32> to vector<8xf32>
      %23 = vector.shape_cast %22 : vector<8xf32> to vector<8x1xf32>
      %24 = arith.addf %21, %23 : vector<8x1xf32>
      %c0_13 = arith.constant 0 : index
      %c0_14 = arith.constant 0 : index
      %25 = vector.load %arg6[%c0_13, %c0_14] : memref<8x1xf32, #tpu.memory_space<vmem>>, vector<8x1xf32>
      tpu.vector_store %arg6[%c0_13, %c0_14], %24 {strides = array<i32>} : memref<8x1xf32, #tpu.memory_space<vmem>>, vector<8x1xf32>,
    } else {
    }
    %c0_i32_6 = arith.constant 0 : i32
    %14 = arith.cmpi eq, %7, %c0_i32_6 : i32
    %15 = arith.extui %14 : i1 to i32
    %c0_i32_7 = arith.constant 0 : i32
    %16 = arith.cmpi ne, %15, %c0_i32_7 : i32
    scf.if %16 {
      %20 = math.log %5 : vector<8x256xf32>
      %21 = vector.broadcast %6 : f32 to vector<8x256xf32>
      %22 = arith.mulf %21, %20 : vector<8x256xf32>
      %23 = math.exp %22 : vector<8x256xf32>
      %c0_10 = arith.constant 0 : index
      %c0_11 = arith.constant 0 : index
      %24 = vector.load %arg6[%c0_10, %c0_11] : memref<8x1xf32, #tpu.memory_space<vmem>>, vector<8x1xf32>
      %cst_12 = arith.constant dense<0.000000e+00> : vector<8xf32>
      %25 = vector.multi_reduction <add>, %23, %cst_12 [1] : vector<8x256xf32> to vector<8xf32>
      %26 = vector.shape_cast %25 : vector<8xf32> to vector<8x1xf32>
      %27 = arith.addf %24, %26 : vector<8x1xf32>
      %c0_13 = arith.constant 0 : index
      %c0_14 = arith.constant 0 : index
      %28 = vector.load %arg6[%c0_13, %c0_14] : memref<8x1xf32, #tpu.memory_space<vmem>>, vector<8x1xf32>
      tpu.vector_store %arg6[%c0_13, %c0_14], %27 {strides = array<i32>} : memref<8x1xf32, #tpu.memory_space<vmem>>, vector<8x1xf32>,
    } else {
    }
    %c0_i32_8 = arith.constant 0 : i32
    %17 = arith.cmpi eq, %arg1, %c0_i32_8 : i32
    %18 = arith.extui %17 : i1 to i32
    %c0_i32_9 = arith.constant 0 : i32
    %19 = arith.cmpi ne, %18, %c0_i32_9 : i32
    scf.if %19 {
      %c0_10 = arith.constant 0 : index
      %c0_11 = arith.constant 0 : index
      %20 = vector.load %arg6[%c0_10, %c0_11] : memref<8x1xf32, #tpu.memory_space<vmem>>, vector<8x1xf32>
      %cst_12 = arith.constant 3.906250e-03 : f32
      %21 = vector.broadcast %cst_12 : f32 to vector<8x1xf32>
      %22 = arith.mulf %20, %21 : vector<8x1xf32>
      %23 = math.log %22 : vector<8x1xf32>
      %24 = vector.broadcast %6 : f32 to vector<8x1xf32>
      %25 = arith.divf %23, %24 : vector<8x1xf32>
      %26 = math.exp %25 : vector<8x1xf32>
      %c0_13 = arith.constant 0 : index
      %c0_14 = arith.constant 0 : index
      %27 = vector.load %arg5[%c0_13, %c0_14] : memref<8x1xf32, #tpu.memory_space<vmem>>, vector<8x1xf32>
      tpu.vector_store %arg5[%c0_13, %c0_14], %26 {strides = array<i32>} : memref<8x1xf32, #tpu.memory_space<vmem>>, vector<8x1xf32>,
    } else {
    }
    return
  }
  func.func @transform_0(%arg0: i32, %arg1: i32, %arg2: memref<1xf32, #tpu.memory_space<smem>>, %arg3: memref<1xi32, #tpu.memory_space<smem>>) -> (i32, i32) {
    %c0_i32 = arith.constant 0 : i32
    return %arg0, %arg1 : i32, i32
  }
  func.func @transform_1(%arg0: i32, %arg1: i32, %arg2: memref<1xf32, #tpu.memory_space<smem>>, %arg3: memref<1xi32, #tpu.memory_space<smem>>) -> (i32, i32) {
    %c0_i32 = arith.constant 0 : i32
    %c0_i32_0 = arith.constant 0 : i32
    return %arg0, %c0_i32 : i32, i32
  }
}

</mosaic_0001>

<bundles_post_ra>
// kernel: tpu_custom_call.1
= control target key start
LH: loop header
LB: loop body
LE: loop exit
PB: predicated region body
PF: predicated region fallthrough
CT: control target
= control target key end

     0   :  { %10 = vsyncpa [#allocation7], 0  ;;  %s148_s12 = smov [#allocation6]   ;;  %s205_s0 = inlined_call_operand.<no memory space> [shape: f32[1], index: 0, kind: input, shape index: {}]   ;;  %s206_s1 = inlined_call_operand.<no memory space> [shape: s32[1], index: 1, kind: input, shape index: {}]   ;;  %s207_s2 = inlined_call_operand.hbm [shape: f32[8,256], index: 2, kind: input, shape index: {}]   ;;  %s208_s3 = inlined_call_operand.vmem [shape: f32[8,1], index: 3, kind: output, shape index: {}]  }
   0x1   :  { %s17_s13 = sshll.u32 %s148_s12, 4  ;;  %s124_s16 = scalar_lea.hbm %s207_s2, 256  ;;  %s18_s13 = int_to_ptr.vmem [resolvable:$true] %s17_s13 }
   0x2   :  { %p125_p0 = scmp.ne.s32.totalorder %s207_s2, %s124_s16  ;;  %p128_p1 = scmp.lt.u32.totalorder %s124_s16, %s207_s2 }
   0x4   :  { %p130_p2 = pnand %p128_p1, %p125_p0 }
   0x6   :  { %133 = shalt.err (!%p130_p2)
}
   0x7   :  { %s134_s21 = scalar_lea.vmem %s18_s13, 256  ;;  %p139_p4 = scmp.lt.s32.totalorder %s18_s13, %s18_s13 }
   0x8   :  { %p135_p3 = scmp.ne.s32.totalorder %s18_s13, %s134_s21  ;;  %p140_p5 = scmp.lt.s32.totalorder %s134_s21, %s134_s21 }
   0xa   :  { %p141_p6 = por %p140_p5, %p139_p4 }
   0xc   :  { %p142_p7 = pnand %p141_p6, %p135_p3 }
   0xe   :  { %145 = shalt.err (!%p142_p7)
}
   0xf   :  { %20 = dma.hbm_to_vmem [thread:$0]  %s207_s2, 256, %s18_s13, [#allocation7]  }
  0x10   :  { %146 = dma.done.wait [#allocation7], 256  }
  0x11   :  { %147 = vsyncadd [#allocation7], 4294967040  ;;  %vm28_vm0 = vcmask 7168   ;;  %v149_v0 = vmov 0.0   ;;  %v30_v1 = vld [vmem:[#allocation6] sm:$0xff]  ;;  %v31_v2 = vld [vmem:[#allocation6 + $0x8] sm:$0xff] }
  0x12   :  { %29 = vst.msk [vmem:[#allocation2] sm:$0xff] %vm28_vm0, %v149_v0  ;;  %v32_v3 = vmax.f32 %v30_v1, 1e-06  ;;  %v33_v4 = vmax.f32 %v31_v2, 1e-06  ;;  %p105_p8 = scmp.ne.s32.totalorder %s206_s1, 3 }
  0x14   :  { %39 = sbr.rel (%p105_p8) target bundleno = 171 (0xab), region = 17  ;;  %v40_v5 = vmul.f32 (!%p105_p8), %v32_v3, %v32_v3  ;;  %v41_v6 = vmul.f32 (!%p105_p8), %v33_v4, %v33_v4 }
  0x16   :  { %v42_v7 = vmul.f32 (!%p105_p8), %v40_v5, %v32_v3  ;;  %v43_v8 = vmul.f32 (!%p105_p8), %v41_v6, %v33_v4 }
  0x18   :  { %v45_v9 = vadd.f32 (!%p105_p8), %v43_v8, %v42_v7 }
  0x19   :  { %v44_v10 = vld [vmem:[#allocation2] sm:$0xff] (!%p105_p8) }
  0x1a   :  { %46 = vadd.xlane.f32.xlu0 (!%p105_p8), %v45_v9 }
  0xa7   :  { %v47_v11 = vpop.xlane.xlu0 %46 }
  0xa8   :  { %v48_v12 = vadd.f32 %v47_v11, %v44_v10 }
  0xaa   :  { %50 = vst.msk [vmem:[#allocation2] sm:$0xff] %vm28_vm0, %v48_v12 }
  0xab PF:  { %p106_p9 = scmp.ne.s32.totalorder %s206_s1, 2 }
  0xac   :  { %v55_v13 = vmul.f32 (!%p106_p9), %v32_v3, %v32_v3  ;;  %v56_v14 = vmul.f32 (!%p106_p9), %v33_v4, %v33_v4 }
  0xad   :  { %54 = sbr.rel (%p106_p9) target bundleno = 321 (0x141), region = 21 }
  0xae   :  { %v58_v15 = vadd.f32 (!%p106_p9), %v56_v14, %v55_v13 }
  0xb0   :  { %59 = vadd.xlane.f32.xlu0 (!%p106_p9), %v58_v15 }
  0xb1   :  { %v57_v16 = vld [vmem:[#allocation2] sm:$0xff] (!%p106_p9) }
 0x13d   :  { %v60_v17 = vpop.xlane.xlu0 %59 }
 0x13e   :  { %v61_v18 = vadd.f32 %v60_v17, %v57_v16 }
 0x140   :  { %63 = vst.msk [vmem:[#allocation2] sm:$0xff] %vm28_vm0, %v61_v18 }
 0x141 PF:  { %p107_p10 = scmp.ne.s32.totalorder %s206_s1, 0 }
 0x142   :  { %110 = vlog2.f32 (!%p107_p10), %v32_v3  ;;  %v72_v20 = vstv (!%p107_p10), %s205_s0 }
 0x143   :  { %67 = sbr.rel (%p107_p10) target bundleno = 498 (0x1f2), region = 25  ;;  %112 = vlog2.f32 (!%p107_p10), %v33_v4 }
 0x147   :  { %v79_v31 = vld [vmem:[#allocation2] sm:$0xff] (!%p107_p10) }
 0x14c   :  { %v111_v19 = vpop.eup %110 }
 0x14d   :  { %v113_v21 = vpop.eup %112  ;;  %v69_v22 = vmul.f32 0.6931472, %v111_v19 }
 0x14e   :  { %v71_v23 = vmul.f32 0.6931472, %v113_v21 }
 0x14f   :  { %v73_v24 = vmul.f32 %v72_v20, %v69_v22 }
 0x150   :  { %v74_v25 = vmul.f32 %v72_v20, %v71_v23 }
 0x151   :  { %v75_v26 = vmul.f32 1.442695, %v73_v24 }
 0x152   :  { %v77_v27 = vmul.f32 1.442695, %v74_v25 }
 0x153   :  { %114 = vpow2.f32 %v75_v26 }
 0x154   :  { %116 = vpow2.f32 %v77_v27 }
 0x15d   :  { %v115_v28 = vpop.eup %114 }
 0x15e   :  { %v117_v29 = vpop.eup %116 }
 0x15f   :  { %v80_v30 = vadd.f32 %v117_v29, %v115_v28 }
 0x161   :  { %81 = vadd.xlane.f32.xlu0 %v80_v30 }
 0x1ee   :  { %v82_v32 = vpop.xlane.xlu0 %81 }
 0x1ef   :  { %v83_v33 = vadd.f32 %v82_v32, %v79_v31 }
 0x1f1   :  { %85 = vst.msk [vmem:[#allocation2] sm:$0xff] %vm28_vm0, %v83_v33 }
 0x1f2 PF:  { %v93_v35 = vstv %s205_s0 }
 0x1f3   :  { %118 = vrcp.f32 %v93_v35 }
 0x1f8   :  { %v89_v34 = vld [vmem:[#allocation2] sm:$0xff] }
 0x1f9   :  { %v90_v36 = vmul.f32 0.00390625, %v89_v34 }
 0x1fb   :  { %120 = vlog2.f32 %v90_v36 }
 0x1fd   :  { %v119_v37 = vpop.eup %118 }
 0x205   :  { %v121_v38 = vpop.eup %120 }
 0x206   :  { %v92_v39 = vmul.f32 0.6931472, %v121_v38 }
 0x208   :  { %v95_v40 = vmul.f32 %v119_v37, %v92_v39 }
 0x20a   :  { %v96_v41 = vmul.f32 1.442695, %v95_v40 }
 0x20c   :  { %122 = vpow2.f32 %v96_v41 }
 0x216   :  { %v123_v42 = vpop.eup %122 }
 0x217   :  { %99 = vst.msk [vmem:[%s208_s3] sm:$0xff] %vm28_vm0, %v123_v42 }
 0x218   :  { %104 = vsyncpa [#allocation7], 1 }

</bundles_post_ra>
